<compile_context>
chip_gen: v7x
topology: tpu7x:2x2x1
jax: 0.10.0
libtpu: 0.0.40
codegen_flags: <defaults>
</compile_context>

<pallas_src>
import numpy as np
from functools import lru_cache

import jax
import jax.numpy as jnp
from jax import lax
from jax.experimental import pallas as pl
from jax.experimental.pallas import tpu as pltpu

POOL_SIZES = (1, 2, 3, 6)
K_UP = sum(ps * ps for ps in POOL_SIZES)     # 50 pooled "cells" per image
K_PAD = 64                                   # zero-padded to a clean tile depth
BN_EPS = 1e-5
VMEM_LIMIT = 48 * 1024 * 1024                # fits v7x 64MiB, raises v5e's 16MiB default


# ------------------------------ Pallas kernels ------------------------------ #
def branch_kernel(p1_ref, p2_ref, p3_ref, p6_ref,
                  w1_ref, w2_ref, w3_ref, w6_ref, s_ref):
    """Fused per-branch 1x1 conv on the pooled maps, all branches -> one output.

    p*_ref : (1, ps*ps, Cin)   f32  pooled features (one image per grid step)
    w*_ref : (Cin, Cpad)       f32  fused weight = branch_w @ final_conv_slice
    s_ref  : (1, K_PAD, Cpad)  f32  stacked branch contributions (rows 50:64 = 0)
    """
    off = 0
    for p_ref, w_ref in ((p1_ref, w1_ref), (p2_ref, w2_ref),
                         (p3_ref, w3_ref), (p6_ref, w6_ref)):
        pp = p_ref.shape[1]
        s_ref[0, off:off + pp, :] = jnp.dot(p_ref[0], w_ref[...],
                                            preferred_element_type=jnp.float32)
        off += pp
    s_ref[0, off:, :] = jnp.zeros((s_ref.shape[1] - off, s_ref.shape[2]),
                                  jnp.float32)


def make_fused_rows_kernel(hw, masked):
    """Row-tiled pre-BN output (bf16) + per-block BatchNorm partial moments."""

    def fused_rows_kernel(x_ref, m_ref, s_ref, wfx_ref, bft_ref,
                          y_ref, sum_ref, sq_ref):
        # x_ref   : (TR, Cin)        bf16  raw features (row = h*W + w within image)
        # m_ref   : (TR, K_PAD)      f32   hstacked bilinear upsample matrix
        # s_ref   : (1, K_PAD, Cpad) f32   stacked branch contributions (this image)
        # wfx_ref : (Cin, Cpad)      bf16  raw-feature slice of the final 1x1 conv
        # bft_ref : (1, Cpad)        f32   folded bias (final + branch biases)
        # y_ref   : (TR, Cpad)       bf16  pre-BN output rows
        # sum/sq  : (8, Cpad)        f32   grouped partial moments for this block
        y = jnp.dot(x_ref[...], wfx_ref[...], preferred_element_type=jnp.float32)
        y = y + jnp.dot(m_ref[...], s_ref[0], preferred_element_type=jnp.float32)
        y = y + bft_ref[...]
        y_ref[...] = y.astype(y_ref.dtype)            # bf16 store (f32 accum kept)

        tr, cpad = y.shape
        if masked:                                    # exclude padded rows from stats
            row = (pl.program_id(1) * tr
                   + lax.broadcasted_iota(jnp.int32, (tr, 1), 0))
            y = jnp.where(row < hw, y, 0.0)
        if tr % 64 == 0:                              # grouped partial reduction
            g = y.reshape(8, tr // 8, cpad)
            sum_ref[...] = jnp.sum(g, axis=1)
            sq_ref[...] = jnp.sum(g * g, axis=1)
        else:                                         # tiny-tile fallback
            sum_ref[...] = jnp.broadcast_to(
                jnp.sum(y, axis=0, keepdims=True) / 8.0, (8, cpad))
            sq_ref[...] = jnp.broadcast_to(
                jnp.sum(y * y, axis=0, keepdims=True) / 8.0, (8, cpad))

    return fused_rows_kernel


def bn_relu_transpose_kernel(y_ref, scale_ref, shift_ref, o_ref):
    """BatchNorm apply + ReLU + in-tile transpose to channel-major output.

    y_ref : (TR, Cpad) bf16   scale/shift : (1, Cpad) f32
    o_ref : (1, Cout, TR) f32 -- only the real Cout channels are written.
    """
    z = jnp.maximum(y_ref[...].astype(jnp.float32) * scale_ref[...]
                    + shift_ref[...], 0.0)
    o_ref[0] = z.T[:o_ref.shape[1], :]


# ------------------------------- host glue ---------------------------------- #
def adaptive_bounds(size, out):
    starts = [(i * size) // out for i in range(out)]
    ends = [int(np.ceil((i + 1) * size / out)) for i in range(out)]
    return starts, ends


def adaptive_max_pool(x_nchw, ps):
    """AdaptiveMaxPool2d(ps) -> (N, ps*ps, Cin)."""
    # TODO(synk): the ragged adaptive-pool window gather stays as jnp glue.
    hs, he = adaptive_bounds(x_nchw.shape[2], ps)
    ws, we = adaptive_bounds(x_nchw.shape[3], ps)
    cells = []
    for i in range(ps):
        for j in range(ps):
            cells.append(jnp.max(x_nchw[:, :, hs[i]:he[i], ws[j]:we[j]],
                                 axis=(2, 3)))            # (N, Cin)
    return jnp.stack(cells, axis=1)                       # (N, ps*ps, Cin)


def interp_weights(out_size, in_size):
    """Bilinear align_corners=True 1-D weights (out, in). Each row sums to 1."""
    w = np.zeros((out_size, in_size), dtype=np.float32)
    if in_size == 1:
        w[:, 0] = 1.0
        return w
    for o in range(out_size):
        src = o * (in_size - 1) / (out_size - 1)
        i0 = min(int(np.floor(src)), in_size - 1)
        i1 = min(i0 + 1, in_size - 1)
        f = src - i0
        w[o, i0] += 1.0 - f
        w[o, i1] += f
    return w


@lru_cache(maxsize=None)
def build_upsample_matrix(H, W, HW_pad):
    """(HW_pad, K_PAD) hstack of the per-branch bilinear matrices, zero-padded."""
    mats = []
    for ps in POOL_SIZES:
        wy = interp_weights(H, ps)
        wx = interp_weights(W, ps)
        mats.append(np.einsum('hi,wj->hwij', wy, wx).reshape(H * W, ps * ps))
    m = np.hstack(mats).astype(np.float32)                # (HW, K_UP)
    out = np.zeros((HW_pad, K_PAD), np.float32)
    out[:H * W, :K_UP] = m
    return out


def pick_row_tile(hw, cin, cpad):
    """Row tile TR (8/128-friendly, VMEM-budgeted) and padded per-image rows."""
    def working_set(tr):   # rough double-buffered kernel-B VMEM footprint (bytes)
        return (2 * tr * (cin * 2 + K_PAD * 4 + cpad * 2)
                + 2 * (K_PAD * cpad * 4 + cin * cpad * 2 + cpad * 4)
                + 4 * 8 * cpad * 4)
    cap = 512
    while cap > 128 and working_set(cap) > 40 * 1024 * 1024:
        cap //= 2
    if hw <= cap:                              # whole (8-padded) image in one tile
        tr = ((hw + 7) // 8) * 8
        return tr, tr
    for tr in (t for t in (512, 256, 128) if t <= cap):
        hw_pad = ((hw + tr - 1) // tr) * tr
        if (hw_pad - hw) * 8 <= hw_pad:        # keep padding waste <= 12.5%
            return tr, hw_pad
    tr = 128
    return tr, ((hw + tr - 1) // tr) * tr


def init_params(key, cin, cout):
    ks = jax.random.split(key, 2 + 2 * len(POOL_SIZES))
    params = {'branch_w': [], 'branch_b': []}
    for i in range(len(POOL_SIZES)):
        params['branch_w'].append(
            0.1 * jax.random.normal(ks[2 * i], (cin, cout), jnp.float32))
        params['branch_b'].append(
            0.1 * jax.random.normal(ks[2 * i + 1], (1, cout), jnp.float32))
    ccat = cin + len(POOL_SIZES) * cout
    params['wf'] = 0.1 * jax.random.normal(ks[-2], (ccat, cout), jnp.float32)
    params['bf'] = 0.1 * jax.random.normal(ks[-1], (1, cout), jnp.float32)
    params['gamma'] = jnp.ones((1, cout), jnp.float32)    # BatchNorm2d default init
    params['beta'] = jnp.zeros((1, cout), jnp.float32)
    return params


def preprocess_params(params, cin, cout, cpad):
    """Fold branch convs/biases into the final conv; pad Cout to lane-dense width."""
    def padc(a, val=0.0):
        return jnp.pad(a, ((0, 0), (0, cpad - cout)), constant_values=val)

    wf = params['wf']                                   # (cin + 4*cout, cout)
    wf_x = padc(wf[4 * cout:4 * cout + cin, :])         # raw-feature slice
    bf_total = padc(params['bf'])
    w_fused = []
    for i, (w_i, b_i) in enumerate(zip(params['branch_w'], params['branch_b'])):
        wf_slice = wf[i * cout:(i + 1) * cout, :]       # (cout, cout)
        w_fused.append(padc(w_i @ wf_slice))            # keep f32 (tiny, exact)
        bf_total = bf_total + padc(b_i @ wf_slice)      # exact: bilinear rows sum to 1
    gamma = padc(params['gamma'], 1.0)
    beta = padc(params['beta'])
    return (wf_x.astype(jnp.bfloat16), w_fused,
            bf_total.astype(jnp.float32), gamma, beta)


def ppmhead_forward(x_nchw, params):
    N, Cin, H, W = x_nchw.shape
    Cout = params['wf'].shape[1]
    Cpad = ((Cout + 127) // 128) * 128                  # lane-dense working channels
    HW = H * W
    TR, HW_pad = pick_row_tile(HW, Cin, Cpad)
    R_TILES = HW_pad // TR
    rows_pad = N * HW_pad
    NB = N * R_TILES

    # ---- layout / pooling glue (XLA, pure data reorg) ----
    # TODO(synk): a channel-major kernel-B variant (y^T = wf_x^T @ x) would fold
    # this input transpose into the kernel too; kept as XLA glue here.
    x_rows = jnp.transpose(x_nchw, (0, 2, 3, 1)).reshape(N, HW, Cin)
    if HW_pad != HW:
        x_rows = jnp.pad(x_rows, ((0, 0), (0, HW_pad - HW), (0, 0)))
    x_rows = x_rows.reshape(rows_pad, Cin).astype(jnp.bfloat16)

    pooled = [adaptive_max_pool(x_nchw, ps) for ps in POOL_SIZES]          # f32
    m_all = jnp.asarray(build_upsample_matrix(H, W, HW_pad))               # f32
    wf_x, w_fused, bf_total, gamma, beta = preprocess_params(params, Cin, Cout, Cpad)

    # ---- kernel A: per-branch fused 1x1 conv -> single stacked S tensor ----
    s_all = pl.pallas_call(
        branch_kernel,
        out_shape=jax.ShapeDtypeStruct((N, K_PAD, Cpad), jnp.float32),
        grid=(N,),
        in_specs=([pl.BlockSpec((1, ps * ps, Cin), lambda n: (n, 0, 0))
                   for ps in POOL_SIZES]
                  + [pl.BlockSpec((Cin, Cpad), lambda n: (0, 0))
                     for _ in POOL_SIZES]),
        out_specs=pl.BlockSpec((1, K_PAD, Cpad), lambda n: (n, 0, 0)),
        compiler_params=pltpu.CompilerParams(dimension_semantics=("parallel",)),
    )(*pooled, *w_fused)

    # ---- kernel B: row-tiled pre-BN output (bf16) + BN partial moments (f32) ----
    y_pre, psum, psq = pl.pallas_call(
        make_fused_rows_kernel(HW, HW_pad != HW),
        out_shape=(jax.ShapeDtypeStruct((rows_pad, Cpad), jnp.bfloat16),
                   jax.ShapeDtypeStruct((NB * 8, Cpad), jnp.float32),
                   jax.ShapeDtypeStruct((NB * 8, Cpad), jnp.float32)),
        grid=(N, R_TILES),
        in_specs=[
            pl.BlockSpec((TR, Cin), lambda n, r: (n * R_TILES + r, 0)),     # x rows
            pl.BlockSpec((TR, K_PAD), lambda n, r: (r, 0)),                 # upsample M
            pl.BlockSpec((1, K_PAD, Cpad), lambda n, r: (n, 0, 0)),         # S (per image)
            pl.BlockSpec((Cin, Cpad), lambda n, r: (0, 0)),                 # wf_x
            pl.BlockSpec((1, Cpad), lambda n, r: (0, 0)),                   # folded bias
        ],
        out_specs=(
            pl.BlockSpec((TR, Cpad), lambda n, r: (n * R_TILES + r, 0)),
            pl.BlockSpec((8, Cpad), lambda n, r: (n * R_TILES + r, 0)),
            pl.BlockSpec((8, Cpad), lambda n, r: (n * R_TILES + r, 0)),
        ),
        compiler_params=pltpu.CompilerParams(
            dimension_semantics=("parallel", "parallel"),
            vmem_limit_bytes=VMEM_LIMIT),
    )(x_rows, m_all, s_all, wf_x, bf_total)

    # ---- batch statistics (tiny per-channel reduction of the partial moments) ----
    n_valid = float(N * HW)
    mean = jnp.sum(psum, axis=0, keepdims=True) / n_valid
    var = jnp.sum(psq, axis=0, keepdims=True) / n_valid - mean * mean  # biased (training)
    scale = gamma / jnp.sqrt(var + BN_EPS)
    shift = beta - mean * scale

    # ---- kernel C: BN apply + ReLU + fused transpose, real channels only ----
    out_cm = pl.pallas_call(
        bn_relu_transpose_kernel,
        out_shape=jax.ShapeDtypeStruct((N, Cout, HW_pad), jnp.float32),
        grid=(N, R_TILES),
        in_specs=[pl.BlockSpec((TR, Cpad), lambda n, r: (n * R_TILES + r, 0)),
                  pl.BlockSpec((1, Cpad), lambda n, r: (0, 0)),
                  pl.BlockSpec((1, Cpad), lambda n, r: (0, 0))],
        out_specs=pl.BlockSpec((1, Cout, TR), lambda n, r: (n, 0, r)),
        compiler_params=pltpu.CompilerParams(
            dimension_semantics=("parallel", "parallel"),
            vmem_limit_bytes=VMEM_LIMIT),
    )(y_pre, scale, shift)

    if HW_pad != HW:
        out_cm = out_cm[:, :, :HW]
    return out_cm.reshape(N, Cout, H, W)                # already NCHW


# --------------------------- numpy reference -------------------------------- #
def reference_forward(x_nchw, params):
    x = np.asarray(x_nchw, dtype=np.float64)
    N, Cin, H, W = x.shape
    Cout = params['wf'].shape[1]
    outs = []
    for ps, w, b in zip(POOL_SIZES, params['branch_w'], params['branch_b']):
        hs, he = adaptive_bounds(H, ps)
        wsl, we = adaptive_bounds(W, ps)
        pooled = np.zeros((N, Cin, ps, ps))
        for i in range(ps):
            for j in range(ps):
                pooled[:, :, i, j] = x[:, :, hs[i]:he[i],
                                       wsl[j]:we[j]].max(axis=(2, 3))
        conv = np.einsum('ncij,cd->ndij', pooled, np.asarray(w, np.float64))
        conv = conv + np.asarray(b, np.float64).reshape(1, Cout, 1, 1)
        wy = interp_weights(H, ps).astype(np.float64)
        wx = interp_weights(W, ps).astype(np.float64)
        outs.append(np.einsum('hi,wj,ndij->ndhw', wy, wx, conv))
    cat = np.concatenate(outs + [x], axis=1)
    y = np.einsum('nchw,cd->ndhw', cat, np.asarray(params['wf'], np.float64))
    y = y + np.asarray(params['bf'], np.float64).reshape(1, Cout, 1, 1)
    mean = y.mean(axis=(0, 2, 3), keepdims=True)
    var = y.var(axis=(0, 2, 3), keepdims=True)
    y = (y - mean) / np.sqrt(var + 1e-5)
    y = y * np.asarray(params['gamma'], np.float64).reshape(1, Cout, 1, 1)
    y = y + np.asarray(params['beta'], np.float64).reshape(1, Cout, 1, 1)
    return np.maximum(y, 0.0)


if __name__ == "__main__":
    N, C_IN, C_OUT, H, W = 2, 32, 16, 16, 16
    key = jax.random.PRNGKey(0)
    kx, kp = jax.random.split(key)
    x = jax.random.normal(kx, (N, C_IN, H, W), jnp.float32)   # NCHW like PyTorch
    params = init_params(kp, C_IN, C_OUT)

    out = jax.block_until_ready(ppmhead_forward(x, params))
    assert out.shape == (N, C_OUT, H, W)

    ref = reference_forward(x, params)
    err = np.max(np.abs(np.asarray(out, np.float64) - ref))
    assert err < 5e-2, f"max abs error {err}"
    print("KERNEL_OK")
</pallas_src>

<mosaic_0001>
module attributes {stable_mosaic.version = 11 : i64} {
  func.func @branch_kernel(%arg0: i32, %arg1: memref<1x1x32xf32, #tpu.memory_space<vmem>>, %arg2: memref<1x4x32xf32, #tpu.memory_space<vmem>>, %arg3: memref<1x9x32xf32, #tpu.memory_space<vmem>>, %arg4: memref<1x36x32xf32, #tpu.memory_space<vmem>>, %arg5: memref<32x128xf32, #tpu.memory_space<vmem>>, %arg6: memref<32x128xf32, #tpu.memory_space<vmem>>, %arg7: memref<32x128xf32, #tpu.memory_space<vmem>>, %arg8: memref<32x128xf32, #tpu.memory_space<vmem>>, %arg9: memref<1x64x128xf32, #tpu.memory_space<vmem>>) attributes {dimension_semantics = [#tpu.dimension_semantics<parallel>], iteration_bounds = array<i64: 2>, scalar_prefetch = 0 : i64, scratch_operands = 0 : i64, tpu.core_type = #tpu.core_type<tc>, window_params = [{transform_indices = @transform_0, window_bounds = array<i64: 1, 1, 32>}, {transform_indices = @transform_1, window_bounds = array<i64: 1, 4, 32>}, {transform_indices = @transform_2, window_bounds = array<i64: 1, 9, 32>}, {transform_indices = @transform_3, window_bounds = array<i64: 1, 36, 32>}, {pipeline_mode = #tpu.pipeline_mode<synchronous>, transform_indices = @transform_4, window_bounds = array<i64: 32, 128>}, {pipeline_mode = #tpu.pipeline_mode<synchronous>, transform_indices = @transform_5, window_bounds = array<i64: 32, 128>}, {pipeline_mode = #tpu.pipeline_mode<synchronous>, transform_indices = @transform_6, window_bounds = array<i64: 32, 128>}, {pipeline_mode = #tpu.pipeline_mode<synchronous>, transform_indices = @transform_7, window_bounds = array<i64: 32, 128>}, {transform_indices = @transform_8, window_bounds = array<i64: 1, 64, 128>}]} {
    %c0 = arith.constant 0 : index
    %c0_0 = arith.constant 0 : index
    %c0_1 = arith.constant 0 : index
    %0 = vector.load %arg1[%c0, %c0_0, %c0_1] : memref<1x1x32xf32, #tpu.memory_space<vmem>>, vector<1x1x32xf32>
    %1 = vector.shape_cast %0 : vector<1x1x32xf32> to vector<1x32xf32>
    %c0_2 = arith.constant 0 : index
    %c0_3 = arith.constant 0 : index
    %2 = vector.load %arg5[%c0_2, %c0_3] : memref<32x128xf32, #tpu.memory_space<vmem>>, vector<32x128xf32>
    %cst = arith.constant dense<0.000000e+00> : vector<1x128xf32>
    %3 = tpu.matmul %1, %2, %cst {dimension_numbers = #tpu.dot_dimension_numbers<[1], [0], [0], [1], [0, 0, 1, 1], [], []>} : vector<1x32xf32>, vector<32x128xf32>, vector<1x128xf32> -> vector<1x128xf32>
    %c0_4 = arith.constant 0 : index
    %c0_5 = arith.constant 0 : index
    %c0_6 = arith.constant 0 : index
    %4 = vector.load %arg9[%c0_4, %c0_5, %c0_6] : memref<1x64x128xf32, #tpu.memory_space<vmem>>, vector<1x1x128xf32>
    %5 = vector.shape_cast %4 : vector<1x1x128xf32> to vector<1x128xf32>
    %6 = vector.shape_cast %3 : vector<1x128xf32> to vector<1x1x128xf32>
    tpu.vector_store %arg9[%c0_4, %c0_5, %c0_6], %6 {strides = array<i32>} : memref<1x64x128xf32, #tpu.memory_space<vmem>>, vector<1x1x128xf32>,
    %c0_7 = arith.constant 0 : index
    %c0_8 = arith.constant 0 : index
    %c0_9 = arith.constant 0 : index
    %7 = vector.load %arg2[%c0_7, %c0_8, %c0_9] : memref<1x4x32xf32, #tpu.memory_space<vmem>>, vector<1x4x32xf32>
    %8 = vector.shape_cast %7 : vector<1x4x32xf32> to vector<4x32xf32>
    %c0_10 = arith.constant 0 : index
    %c0_11 = arith.constant 0 : index
    %9 = vector.load %arg6[%c0_10, %c0_11] : memref<32x128xf32, #tpu.memory_space<vmem>>, vector<32x128xf32>
    %cst_12 = arith.constant dense<0.000000e+00> : vector<4x128xf32>
    %10 = tpu.matmul %8, %9, %cst_12 {dimension_numbers = #tpu.dot_dimension_numbers<[1], [0], [0], [1], [0, 0, 1, 1], [], []>} : vector<4x32xf32>, vector<32x128xf32>, vector<4x128xf32> -> vector<4x128xf32>
    %c0_13 = arith.constant 0 : index
    %c1 = arith.constant 1 : index
    %c0_14 = arith.constant 0 : index
    %11 = vector.load %arg9[%c0_13, %c1, %c0_14] : memref<1x64x128xf32, #tpu.memory_space<vmem>>, vector<1x4x128xf32>
    %12 = vector.shape_cast %11 : vector<1x4x128xf32> to vector<4x128xf32>
    %13 = vector.shape_cast %10 : vector<4x128xf32> to vector<1x4x128xf32>
    tpu.vector_store %arg9[%c0_13, %c1, %c0_14], %13 {strides = array<i32>} : memref<1x64x128xf32, #tpu.memory_space<vmem>>, vector<1x4x128xf32>,
    %c0_15 = arith.constant 0 : index
    %c0_16 = arith.constant 0 : index
    %c0_17 = arith.constant 0 : index
    %14 = vector.load %arg3[%c0_15, %c0_16, %c0_17] : memref<1x9x32xf32, #tpu.memory_space<vmem>>, vector<1x9x32xf32>
    %15 = vector.shape_cast %14 : vector<1x9x32xf32> to vector<9x32xf32>
    %c0_18 = arith.constant 0 : index
    %c0_19 = arith.constant 0 : index
    %16 = vector.load %arg7[%c0_18, %c0_19] : memref<32x128xf32, #tpu.memory_space<vmem>>, vector<32x128xf32>
    %cst_20 = arith.constant dense<0.000000e+00> : vector<9x128xf32>
    %17 = tpu.matmul %15, %16, %cst_20 {dimension_numbers = #tpu.dot_dimension_numbers<[1], [0], [0], [1], [0, 0, 1, 1], [], []>} : vector<9x32xf32>, vector<32x128xf32>, vector<9x128xf32> -> vector<9x128xf32>
    %c0_21 = arith.constant 0 : index
    %c5 = arith.constant 5 : index
    %c0_22 = arith.constant 0 : index
    %18 = vector.load %arg9[%c0_21, %c5, %c0_22] : memref<1x64x128xf32, #tpu.memory_space<vmem>>, vector<1x9x128xf32>
    %19 = vector.shape_cast %18 : vector<1x9x128xf32> to vector<9x128xf32>
    %20 = vector.shape_cast %17 : vector<9x128xf32> to vector<1x9x128xf32>
    tpu.vector_store %arg9[%c0_21, %c5, %c0_22], %20 {strides = array<i32>} : memref<1x64x128xf32, #tpu.memory_space<vmem>>, vector<1x9x128xf32>,
    %c0_23 = arith.constant 0 : index
    %c0_24 = arith.constant 0 : index
    %c0_25 = arith.constant 0 : index
    %21 = vector.load %arg4[%c0_23, %c0_24, %c0_25] : memref<1x36x32xf32, #tpu.memory_space<vmem>>, vector<1x36x32xf32>
    %22 = vector.shape_cast %21 : vector<1x36x32xf32> to vector<36x32xf32>
    %c0_26 = arith.constant 0 : index
    %c0_27 = arith.constant 0 : index
    %23 = vector.load %arg8[%c0_26, %c0_27] : memref<32x128xf32, #tpu.memory_space<vmem>>, vector<32x128xf32>
    %cst_28 = arith.constant dense<0.000000e+00> : vector<36x128xf32>
    %24 = tpu.matmul %22, %23, %cst_28 {dimension_numbers = #tpu.dot_dimension_numbers<[1], [0], [0], [1], [0, 0, 1, 1], [], []>} : vector<36x32xf32>, vector<32x128xf32>, vector<36x128xf32> -> vector<36x128xf32>
    %c0_29 = arith.constant 0 : index
    %c14 = arith.constant 14 : index
    %c0_30 = arith.constant 0 : index
    %25 = vector.load %arg9[%c0_29, %c14, %c0_30] : memref<1x64x128xf32, #tpu.memory_space<vmem>>, vector<1x36x128xf32>
    %26 = vector.shape_cast %25 : vector<1x36x128xf32> to vector<36x128xf32>
    %27 = vector.shape_cast %24 : vector<36x128xf32> to vector<1x36x128xf32>
    tpu.vector_store %arg9[%c0_29, %c14, %c0_30], %27 {strides = array<i32>} : memref<1x64x128xf32, #tpu.memory_space<vmem>>, vector<1x36x128xf32>,
    %cst_31 = arith.constant 0.000000e+00 : f32
    %28 = vector.broadcast %cst_31 : f32 to vector<14x128xf32>
    %c0_32 = arith.constant 0 : index
    %c50 = arith.constant 50 : index
    %c0_33 = arith.constant 0 : index
    %29 = vector.load %arg9[%c0_32, %c50, %c0_33] : memref<1x64x128xf32, #tpu.memory_space<vmem>>, vector<1x14x128xf32>
    %30 = vector.shape_cast %29 : vector<1x14x128xf32> to vector<14x128xf32>
    %31 = vector.shape_cast %28 : vector<14x128xf32> to vector<1x14x128xf32>
    tpu.vector_store %arg9[%c0_32, %c50, %c0_33], %31 {strides = array<i32>} : memref<1x64x128xf32, #tpu.memory_space<vmem>>, vector<1x14x128xf32>,
    return
  }
  func.func @transform_0(%arg0: i32) -> (i32, i32, i32) {
    %c0_i32 = arith.constant 0 : i32
    %c0_i32_0 = arith.constant 0 : i32
    %c0_i32_1 = arith.constant 0 : i32
    return %arg0, %c0_i32, %c0_i32_0 : i32, i32, i32
  }
  func.func @transform_1(%arg0: i32) -> (i32, i32, i32) {
    %c0_i32 = arith.constant 0 : i32
    %c0_i32_0 = arith.constant 0 : i32
    %c0_i32_1 = arith.constant 0 : i32
    return %arg0, %c0_i32, %c0_i32_0 : i32, i32, i32
  }
  func.func @transform_2(%arg0: i32) -> (i32, i32, i32) {
    %c0_i32 = arith.constant 0 : i32
    %c0_i32_0 = arith.constant 0 : i32
    %c0_i32_1 = arith.constant 0 : i32
    return %arg0, %c0_i32, %c0_i32_0 : i32, i32, i32
  }
  func.func @transform_3(%arg0: i32) -> (i32, i32, i32) {
    %c0_i32 = arith.constant 0 : i32
    %c0_i32_0 = arith.constant 0 : i32
    %c0_i32_1 = arith.constant 0 : i32
    return %arg0, %c0_i32, %c0_i32_0 : i32, i32, i32
  }
  func.func @transform_4(%arg0: i32) -> (i32, i32) {
    %c0_i32 = arith.constant 0 : i32
    %c0_i32_0 = arith.constant 0 : i32
    %c0_i32_1 = arith.constant 0 : i32
    return %c0_i32, %c0_i32_0 : i32, i32
  }
  func.func @transform_5(%arg0: i32) -> (i32, i32) {
    %c0_i32 = arith.constant 0 : i32
    %c0_i32_0 = arith.constant 0 : i32
    %c0_i32_1 = arith.constant 0 : i32
    return %c0_i32, %c0_i32_0 : i32, i32
  }
  func.func @transform_6(%arg0: i32) -> (i32, i32) {
    %c0_i32 = arith.constant 0 : i32
    %c0_i32_0 = arith.constant 0 : i32
    %c0_i32_1 = arith.constant 0 : i32
    return %c0_i32, %c0_i32_0 : i32, i32
  }
  func.func @transform_7(%arg0: i32) -> (i32, i32) {
    %c0_i32 = arith.constant 0 : i32
    %c0_i32_0 = arith.constant 0 : i32
    %c0_i32_1 = arith.constant 0 : i32
    return %c0_i32, %c0_i32_0 : i32, i32
  }
  func.func @transform_8(%arg0: i32) -> (i32, i32, i32) {
    %c0_i32 = arith.constant 0 : i32
    %c0_i32_0 = arith.constant 0 : i32
    %c0_i32_1 = arith.constant 0 : i32
    return %arg0, %c0_i32, %c0_i32_0 : i32, i32, i32
  }
}

</mosaic_0001>

<bundles_post_ra>
// kernel: tpu_custom_call.1
= control target key start
LH: loop header
LB: loop body
LE: loop exit
PB: predicated region body
PF: predicated region fallthrough
CT: control target
= control target key end

     0   :  { %13 = vsyncpa [#allocation3], 0  ;;  %s1341_s0 = inlined_call_operand.vmem [shape: f32[2,1,32], index: 0, kind: input, shape index: {}]   ;;  %s1342_s1 = inlined_call_operand.vmem [shape: f32[2,4,32], index: 1, kind: input, shape index: {}]   ;;  %s1343_s2 = inlined_call_operand.vmem [shape: f32[2,9,32], index: 2, kind: input, shape index: {}]   ;;  %s1344_s3 = inlined_call_operand.vmem [shape: f32[2,36,32], index: 3, kind: input, shape index: {}]   ;;  %s1345_s4 = inlined_call_operand.vmem [shape: f32[32,128], index: 4, kind: input, shape index: {}]   ;;  %s1346_s5 = inlined_call_operand.vmem [shape: f32[32,128], index: 5, kind: input, shape index: {}]   ;;  %s1347_s6 = inlined_call_operand.vmem [shape: f32[32,128], index: 6, kind: input, shape index: {}]   ;;  %s1348_s7 = inlined_call_operand.vmem [shape: f32[32,128], index: 7, kind: input, shape index: {}]   ;;  %s1349_s8 = inlined_call_operand.hbm [shape: f32[2,64,128], index: 8, kind: output, shape index: {}]  }
   0x1   :  { %15 = vsyncpa [#allocation3 + $0x1], 0  ;;  %s1125_s27 = smov 0   ;;  %s1127_s28 = smov 0  }
   0x2   :  { %s1129_s29 = smov 0   ;;  %s1131_s30 = smov 0  }
   0x3 LB: > { %s1146_s9 = sadd.s32 4294967295, %s1072_s30   ;;  %s833_s10 = sadd.s32 4294967294, %s1072_s30   ;;  %s1072_s30 = sphi %s1131_s30, %s1355_s30   ;;  %s1068_s29 = sphi %s1129_s29, %s1354_s29   ;;  %s1064_s28 = sphi %s1127_s28, %s1353_s28   ;;  %s1060_s27 = sphi %s1125_s27, %s1352_s27  }
   0x4   : > { %s1150_s11 = sadd.s32 1, %s1072_s30   ;;  %s216_s12 = sadd.s32 1, %s1068_s29 }
   0x5   : > { %s213_s13 = ssub.s32 %s1072_s30, %s1150_s11  ;;  %p226_p0 = scmp.ne.s32.totalorder %s1068_s29, %s1064_s28 }
   0x6   : > { %p214_p1 = scmp.eq.s32.totalorder %s213_s13, 0  ;;  %p227_p2 = scmp.eq.s32.totalorder %s1146_s9, 1 }
   0x7   : > { %p232_p3 = scmp.ne.s32.totalorder %s1064_s28, %s1060_s27  ;;  %p233_p4 = scmp.eq.s32.totalorder %s833_s10, 1 }
   0x8   : > { %s1161_s14 = scalar_select %p214_p1, %s1068_s29, %s216_s12  }
   0x9   : > { %p1163_p5 = por %p227_p2, %p226_p0  ;;  %p1167_p6 = por %p233_p4, %p232_p3 }
   0xa   : > { %p836_p7 = scmp.ge.s32.totalorder %s1072_s30, 1  ;;  %p292_p8 = scmp.lt.s32.totalorder %s1072_s30, 3 }
   0xc   : > { %p293_p9 = pnand %p836_p7, %p292_p8 }
   0xd   : > { %v356_v0 = vld [vmem:[%s1345_s4] sm:$0xff] (!%p293_p9)  ;;  %v357_v1 = vld [vmem:[%s1345_s4 + $0x8] sm:$0xff] (!%p293_p9)  ;;  %v1074_v3 = vmov (!%p293_p9), 0.0|0.0   ;;  %v358_v6 = vld [vmem:[%s1345_s4 + $0x10] sm:$0xff] (!%p293_p9)  ;;  %p338_p10 = scmp.lt.s32.totalorder (!%p293_p9), %s1146_s9, 1  ;;  %s335_s13 = sand.u32 (!%p293_p9), 1, %s1064_s28  }
   0xe   : > { %296 = sbr.rel (%p293_p9) target bundleno = 270 (0x10e), region = 52  ;;  %v608_v2 = vld [vmem:[%s1348_s7] sm:$0xff] (!%p293_p9)  ;;  %939 = vmatprep.subr.bf16.mxu0 (!%p293_p9), %v1074_v3  ;;  %959 = vmatprep.subr.bf16.mxu1 (!%p293_p9), %v1074_v3  ;;  %v940_v4 = vpack.c.bf16 (!%p293_p9), %v357_v1, %v356_v0  ;;  %v609_v5 = vld [vmem:[%s1348_s7 + $0x8] sm:$0xff] (!%p293_p9)  ;;  %v359_v7 = vld [vmem:[%s1345_s4 + $0x18] sm:$0xff] (!%p293_p9)  ;;  %vm1075_vm0 = vmmov (!%p293_p9), 0   ;;  %v1076_v11 = vmov (!%p293_p9), 0.0  }
   0xf   : > { %v960_v8 = vpack.c.bf16 (!%p293_p9), %v609_v5, %v608_v2  ;;  %v610_v9 = vld [vmem:[%s1348_s7 + $0x10] sm:$0xff] (!%p293_p9)  ;;  %v611_v10 = vld [vmem:[%s1348_s7 + $0x18] sm:$0xff] (!%p293_p9)  ;;  %891 = vmatprep.mubr.msk.f32.mxu0 (!%p293_p9), %vm1075_vm0, %v1076_v11  ;;  %924 = vmatprep.mubr.msk.f32.mxu1 (!%p293_p9), %vm1075_vm0, %v1076_v11  ;;  %s837_s21 = sshll.u32 (!%p293_p9), %s335_s13, 6  ;;  %v943_v12 = vpack.c.bf16 (!%p293_p9), %v359_v7, %v358_v6  ;;  %v436_v14 = vld [vmem:[%s1346_s5] sm:$0xff] (!%p293_p9)  ;;  %vm360_vm1 = vcmask (!%p293_p9), 261120  }
  0x10   : > { %941 = vmatpush3.bf16.msra.mxu0 (!%p293_p9), %v940_v4  ;;  %v963_v13 = vpack.c.bf16 (!%p293_p9), %v611_v10, %v610_v9  ;;  %v437_v15 = vld [vmem:[%s1346_s5 + $0x8] sm:$0xff] (!%p293_p9)  ;;  %s1219_s19 = scalar_lea.vmem (!%p293_p9), [#allocation2], %s837_s21  ;;  %v438_v19 = vld [vmem:[%s1346_s5 + $0x10] sm:$0xff] (!%p293_p9)  ;;  %v439_v20 = vld [vmem:[%s1346_s5 + $0x18] sm:$0xff] (!%p293_p9) }
  0x11   : > { %961 = vmatpush3.bf16.msra.mxu1 (!%p293_p9), %v960_v8  ;;  %942 = vmatprep.subr.bf16.mxu0 (!%p293_p9), %v1074_v3  ;;  %722 = vst [vmem:[%s1219_s19 + $0x32] sm:$0xff] (!%p293_p9), %v1076_v11  ;;  %723 = vst [vmem:[%s1219_s19 + $0x3a] sm:$0x3f] (!%p293_p9), %v1076_v11  ;;  %v946_v17 = vpack.c.bf16 (!%p293_p9), %v437_v15, %v436_v14  ;;  %v516_v21 = vld [vmem:[%s1347_s6] sm:$0xff] (!%p293_p9)  ;;  %v517_v22 = vld [vmem:[%s1347_s6 + $0x8] sm:$0xff] (!%p293_p9)  ;;  %v949_v23 = vpack.c.bf16 (!%p293_p9), %v439_v20, %v438_v19  ;;  %s738_s25 = sshll.u32 (!%p293_p9), %s1219_s19, 4  ;;  %s1293_s25 = int_to_ptr.vmem [resolvable:$true] %s738_s25 }
  0x12   : > { %962 = vmatprep.subr.bf16.mxu1 (!%p293_p9), %v1074_v3  ;;  %v951_v25 = vpack.c.bf16 (!%p293_p9), %v517_v22, %v516_v21  ;;  %v518_v26 = vld [vmem:[%s1347_s6 + $0x10] sm:$0xff] (!%p293_p9)  ;;  %v519_v27 = vld [vmem:[%s1347_s6 + $0x18] sm:$0xff] (!%p293_p9)  ;;  %s1010_s20 = scalar_lea.vmem (!%p293_p9), %s1293_s25, 1024 }
  0x13   : > { %v955_v30 = vpack.c.bf16 (!%p293_p9), %v519_v27, %v518_v26  ;;  %p1011_p11 = scmp.ne.s32.totalorder (!%p293_p9), %s1293_s25, %s1010_s20 }
  0x14   : > { %944 = vmatpush3.bf16.msra.mxu0 (!%p293_p9), %v943_v12 }
  0x15   : > { %s1206_s22 = scalar_select %p338_p10, %s1146_s9, 1  ;;  %964 = vmatpush3.bf16.msra.mxu1 %v963_v13  ;;  %945 = vmatprep.subr.bf16.mxu0 %v1074_v3 }
  0x16   : > { %p1012_p12 = pnand %p1011_p11, %p1163_p5 }
  0x17   : > { %s340_s17 = scalar_lea.vmem %s1341_s0, %s1206_s22  ;;  %s965_s18 = smul.u32 40, %s1206_s22 }
  0x18   : > { %v355_v16 = vld [vmem:[%s340_s17] sm:$0x1]  ;;  %s838_s12 = sshll.u32 %s1206_s22, 2  ;;  %s856_s10 = sshll.u32 %s1206_s22, 4 }
  0x19   : > { %s1228_s24 = scalar_lea.vmem %s1344_s3, %s965_s18  ;;  %892 = vmatmul.mubr.msk.f32.vlgmr.msra.gmra.mrb[0].mxu0 %vm360_vm1, %v355_v16  ;;  %s344_s26 = scalar_lea.vmem %s1342_s1, %s838_s12 }
  0x1a   : > { %v603_v18 = vld [vmem:[%s1228_s24] sm:$0xff]  ;;  %947 = vmatpush3.bf16.msra.mxu0 %v946_v17  ;;  %v604_v24 = vld [vmem:[%s1228_s24 + $0x8] sm:$0xff]  ;;  %902 = vmatprep.mubr.msk.f32.mxu0 %vm1075_vm0, %v1076_v11  ;;  %s349_s22 = scalar_lea.vmem %s1343_s2, %s856_s10  ;;  %v605_v29 = vld [vmem:[%s1228_s24 + $0x10] sm:$0xff]  ;;  %p1013_p13 = pneg %p1012_p12 }
  0x1b   : > { %925 = vmatmul.mubr.msk.f32.vlgmr.msra.gmra.mrb[0].mxu1 %vm360_vm1, %v603_v18  ;;  %948 = vmatprep.subr.bf16.mxu0 %v1074_v3  ;;  %v435_v28 = vld [vmem:[%s344_s26] sm:$0xf]  ;;  %v606_v32 = vld [vmem:[%s1228_s24 + $0x18] sm:$0xff]  ;;  %v515_v33 = vld [vmem:[%s349_s22 + $0x8] sm:$0x1]  ;;  %s1077_s18 = smov [#allocation2]  }
  0x1c   : > { %927 = vmatprep.mubr.msk.f32.mxu1 %vm1075_vm0, %v1076_v11  ;;  %v514_v31 = vld [vmem:[%s349_s22] sm:$0xff]  ;;  %s1014_s23 = sshll.u32 %s1077_s18, 4  ;;  %s1015_s23 = int_to_ptr.vmem [resolvable:$false] %s1014_s23 }
  0x1d   : > { %v607_v34 = vld [vmem:[%s1228_s24 + $0x20] sm:$0xf]  ;;  %s857_s24 = sshll.u32 %s1146_s9, 10  ;;  %s1300_s9 = scalar_lea.sflag [#allocation3], %s335_s13 }
  0x1e   : > { %950 = vmatpush3.bf16.msra.mxu0 %v949_v23  ;;  %s1291_s17 = scalar_lea.hbm %s1349_s8, %s857_s24  ;;  %s1016_s21 = scalar_lea.vmem %s1015_s23, 2048 }
  0x1f   : > { %928 = vmatmul.mubr.msk.f32.gmra.mrb[2].mxu1 %vm360_vm1, %v604_v24  ;;  %952 = vmatprep.subr.bf16.mxu0 %v951_v25  ;;  %p1017_p0 = scmp.lt.s32.totalorder %s1293_s25, %s1015_s23  ;;  %p1018_p1 = scmp.lt.s32.totalorder %s1016_s21, %s1010_s20 }
  0x20   : > { %930 = vmatprep.mubr.msk.f32.mxu1 %vm1075_vm0, %v1076_v11 }
  0x21   : > { %903 = vmatmul.mubr.msk.f32.vlgmr.msra.gmra.mrb[2].mxu0 %vm360_vm1, %v435_v28  ;;  %p1019_p2 = por %p1018_p1, %p1017_p0 }
  0x22   : > { %954 = vmatpush3.bf16.msra.mxu0 %v951_v25  ;;  %913 = vmatprep.mubr.msk.f32.mxu0 %vm360_vm1, %v514_v31 }
  0x23   : > { %931 = vmatmul.mubr.msk.f32.gmra.mrb[4].mxu1 %vm360_vm1, %v605_v29  ;;  %956 = vmatprep.subr.bf16.mxu0 %v955_v30  ;;  %p1020_p3 = pnand %p1019_p2, %p1013_p13 }
  0x24   : > { %933 = vmatprep.mubr.msk.f32.mxu1 %vm1075_vm0, %v1076_v11 }
  0x26   : > { %958 = vmatpush3.bf16.msra.mxu0 %v955_v30 }
  0x27   : > { %934 = vmatmul.mubr.msk.f32.gmra.mrb[6].mxu1 %vm360_vm1, %v606_v32 }
  0x28   : > { %936 = vmatprep.mubr.msk.f32.mxu1 %vm1075_vm0, %v1076_v11 }
  0x29   : > { %914 = vmatmul.mubr.msk.f32.vlgmr.msra.gmra.mrb[4].mxu0 %vm360_vm1, %v515_v33 }
  0x2b   : > { %937 = vmatmul.mubr.msk.f32.gmra.mrb[8].mxu1 %vm360_vm1, %v607_v34 }
  0xec   : > { %v430_v35 = vpop.f32.mrb[0].mxu0 }
  0xed   : > { %434 = vst [vmem:[%s1219_s19] sm:$0x1] %v430_v35  ;;  %v893_v37 = vpop.f32.mrb[1].mxu0 }
  0xee   : > { %v693_v36 = vpop.f32.mrb[0].mxu1 }
  0xef   : > { %717 = vst [vmem:[%s1219_s19 + $0xe] sm:$0xff] %v693_v36  ;;  %v926_v38 = vpop.f32.mrb[1].mxu1 }
  0xf2   : > { %v698_v39 = vpop.f32.mrb[2].mxu1 }
  0xf3   : > { %718 = vst [vmem:[%s1219_s19 + $0x16] sm:$0xff] %v698_v39  ;;  %v929_v40 = vpop.f32.mrb[3].mxu1 }
  0xf4   : > { %v509_v41 = vpop.f32.mrb[2].mxu0 }
  0xf5   : > { %513 = vst [vmem:[%s1219_s19 + $0x1] sm:$0xf] %v509_v41  ;;  %v904_v43 = vpop.f32.mrb[3].mxu0 }
  0xf6   : > { %v703_v42 = vpop.f32.mrb[4].mxu1 }
  0xf7   : > { %719 = vst [vmem:[%s1219_s19 + $0x1e] sm:$0xff] %v703_v42  ;;  %v932_v44 = vpop.f32.mrb[5].mxu1 }
  0xfa   : > { %v708_v45 = vpop.f32.mrb[6].mxu1 }
  0xfb   : > { %720 = vst [vmem:[%s1219_s19 + $0x26] sm:$0xff] %v708_v45  ;;  %v935_v46 = vpop.f32.mrb[7].mxu1 }
  0xfc   : > { %v915_v47 = vpop.f32.mrb[4].mxu0 }
  0xfd   : > { %602 = vst [vmem:[%s1219_s19 + $0xd] sm:$0x1] %v915_v47  ;;  %v592_v49 = vpop.f32.mrb[5].mxu0 }
  0xfe   : > { %v713_v48 = vpop.f32.mrb[8].mxu1  ;;  %601 = vst [vmem:[%s1219_s19 + $0x5] sm:$0xff] %v592_v49 }
  0xff   : > { %721 = vst [vmem:[%s1219_s19 + $0x2e] sm:$0xf] %v713_v48  ;;  %v938_v50 = vpop.f32.mrb[9].mxu1 }
 0x100   : > { %1023 = shalt.err (!%p1020_p3)
}
 0x101   : > { %s1024_s13 = scalar_lea.hbm %s1291_s17, 1024  ;;  %s1028_s22 = scalar_lea.hbm %s1349_s8, 2048 }
 0x102   : > { %p1025_p4 = scmp.ne.s32.totalorder %s1291_s17, %s1024_s13  ;;  %p1029_p9 = scmp.lt.u32.totalorder %s1291_s17, %s1349_s8 }
 0x103   : > { %p1030_p10 = scmp.lt.u32.totalorder %s1028_s22, %s1024_s13  ;;  %p1032_p12 = scmp.lt.u32.totalorder %s1024_s13, %s1291_s17 }
 0x104   : > { %p1026_p7 = pnand %p1025_p4, %p1163_p5 }
 0x105   : > { %p1031_p11 = por %p1030_p10, %p1029_p9 }
 0x106   : > { %p1027_p8 = pneg %p1026_p7 }
 0x107   : > { %p1033_p13 = por %p1032_p12, %p1031_p11 }
 0x109   : > { %p1034_p0 = pnand %p1033_p13, %p1027_p8 }
 0x10b   : > { %1037 = shalt.err (!%p1034_p0)
}
 0x10c   : > { %s1078_s10 = smov 128   ;;  %s1079_s20 = smov 8  }
 0x10d   : > { %966 = dma.vmem_to_hbm [thread:$0]  (%p1163_p5), %s1293_s25, 1024, %s1291_s17, %s1300_s9, %s1078_s10, %s1078_s10, %s1079_s20  }
 0x10e PF: > { %p972_p1 = scmp.ge.s32.totalorder %s1072_s30, 2  ;;  %s753_s18 = sand.u32 1, %s1060_s27  }
 0x10f   : > { %s754_s23 = scalar_lea.sflag [#allocation3], %s753_s18 }
 0x110   : > { %p969_p2 = pnand %p972_p1, %p1167_p6 }
 0x112   : > { %1055 = dma.done.wait (!%p969_p2), %s754_s23, 1024  }
 0x113   : > { %1057 = vsyncadd (!%p969_p2), %s754_s23, 4294966272  ;;  %p18_p3 = scmp.ge.s32.totalorder %s1150_s11, 4   ;;  %s1352_s27 = smov %s1064_s28 }
 0x114   : > { %s1353_s28 = smov %s1068_s29  ;;  %s1354_s29 = smov %s1161_s14 }
 0x115   : > { %s1355_s30 = smov %s1150_s11  ;;  %20 = sbr.rel (!%p18_p3) target bundleno = 3 (0x3), region = 96 }
 0x11c   :  { %759 = vsyncpa [#allocation3], 1 }
 0x11d   :  { %761 = vsyncpa [#allocation3 + $0x1], 1 }

</bundles_post_ra>
